<compile_context>
chip_gen: v7x
topology: tpu7x:2x2x1
jax: 0.10.0
libtpu: 0.0.40
codegen_flags: <defaults>
</compile_context>

<pallas_src>
import numpy as np

import jax
import jax.numpy as jnp
from jax.experimental import pallas as pl
from jax.experimental.pallas import tpu as pltpu  # noqa: F401  (TPU backend)


# ----------------------------------------------------------------------------
# Fused Pallas kernel (conv block + flat BN + FC stack)
# ----------------------------------------------------------------------------
def make_fused_kernel(batch, conv_cfg, n_fc, use_bn, t_last, eps=1e-5):
    """conv_cfg: tuple of (K, plk, t_out, t_pool, t_valid) per conv layer.
    n_fc: total number of Linear layers (hidden + output).
    t_last: time extent after the conv stack (flatten factor for FC1 split)."""

    def kernel(*refs):
        o_ref = refs[-1]
        idx = 0
        h = refs[idx][...]                       # (B, T0, C0) channels-last
        idx += 1

        # ---- conv block: Conv1d -> MaxPool1d -> ReLU, channels-last ----
        for (kw, plk, t_out, t_pool, t_valid) in conv_cfg:
            w_ref = refs[idx]                    # (K, C_in, C_out)
            bias = refs[idx + 1][...]            # (1, C_out)
            sel = refs[idx + 2][...]             # (t_pool, t_valid) 0/1 select
            idx += 3
            c_in, c_out = w_ref.shape[1], w_ref.shape[2]

            # Conv1d as sum_k x[:, k:k+t_out, :] @ W_k  (in-kernel, no im2col)
            acc = None
            for k in range(kw):
                xk = h[:, k:k + t_out, :]                        # (B,t_out,Cin)
                wk = jnp.broadcast_to(w_ref[k][None], (batch, c_in, c_out))
                term = jnp.einsum('btc,bco->bto', xk, wk,
                                  preferred_element_type=jnp.float32)
                acc = term if acc is None else acc + term
            acc = acc + bias                                     # (1,Cout) bcast

            # MaxPool1d(plk): running window max (elementwise) + row downselect
            m = acc[:, 0:t_valid, :]
            for j in range(1, plk):
                m = jnp.maximum(m, acc[:, j:j + t_valid, :])
            sel_b = jnp.broadcast_to(sel[None], (batch, t_pool, t_valid))
            pooled = jnp.einsum('bpt,btc->bpc', sel_b, m,
                                preferred_element_type=jnp.float32)
            h = jnp.maximum(pooled, 0.0)                         # ReLU

        # ---- flat BatchNorm1d with batch statistics, kept in (B, T, C) ----
        if use_bn:
            gamma = refs[idx][...]               # (t_last, c_last), permuted
            beta = refs[idx + 1][...]
            idx += 2
            mean = jnp.mean(h, axis=0, keepdims=True)
            var = jnp.mean((h - mean) ** 2, axis=0, keepdims=True)  # biased
            h = (h - mean) * jax.lax.rsqrt(var + eps) * gamma + beta

        # ---- first Linear: contraction over the (T, C) "flat" features ----
        # Weight was pre-permuted to (t_last, c_last, d1) to match torch's
        # channel-major .view(-1, flat_dim) flatten order.
        w1_ref = refs[idx]
        b1 = refs[idx + 1][...]
        idx += 2
        z = None
        for t in range(t_last):
            term = jnp.dot(h[:, t, :], w1_ref[t],
                           preferred_element_type=jnp.float32)
            z = term if z is None else z + term
        z = z + b1
        if n_fc > 1:
            z = jnp.maximum(z, 0.0)              # ReLU after hidden Linear

        # ---- remaining Linear layers ----
        for layer in range(1, n_fc):
            w = refs[idx][...]
            bfc = refs[idx + 1][...]
            idx += 2
            z = jnp.dot(z, w, preferred_element_type=jnp.float32) + bfc
            if layer < n_fc - 1:
                z = jnp.maximum(z, 0.0)

        o_ref[...] = z

    return kernel


# ----------------------------------------------------------------------------
# Wrapper: parameter prep (layout permutations) + single pallas_call
# ----------------------------------------------------------------------------
def neuinv_forward_pallas(x, params, hpar):
    timeBins, inp_chan = hpar['inputShape']
    batch = int(np.prod(x.shape)) // (inp_chan * timeBins)
    h_ncw = x.reshape(batch, inp_chan, timeBins).astype(jnp.float32)
    h_cl = jnp.transpose(h_ncw, (0, 2, 1))            # (B, T, C) channels-last

    use_bn = bool(hpar['batch_norm_flat'])

    args = [h_cl]
    conv_cfg = []
    T, c_in = timeBins, inp_chan
    for (W, b), K, plk in zip(params['conv'],
                              hpar['conv_block']['kernel'],
                              hpar['conv_block']['pool']):
        c_out = W.shape[0]
        t_out = T - K + 1
        t_pool = t_out // plk                          # MaxPool1d truncation
        t_valid = (t_pool - 1) * plk + 1
        conv_cfg.append((int(K), int(plk), int(t_out), int(t_pool), int(t_valid)))

        w_stack = jnp.transpose(W, (2, 1, 0))          # (K, C_in, C_out)
        sel = np.zeros((t_pool, t_valid), np.float32)  # picks rows tp*plk
        sel[np.arange(t_pool), np.arange(t_pool) * plk] = 1.0
        args += [w_stack, b.reshape(1, c_out), jnp.asarray(sel)]
        T, c_in = t_pool, c_out

    t_last, c_last = T, c_in                           # conv-stack output (T, C)

    if use_bn:
        # torch flat index i = c*T + t ; our layout index is (t, c)
        args += [params['gamma'].reshape(c_last, t_last).T,
                 params['beta'].reshape(c_last, t_last).T]

    fc = params['fc']
    n_fc = len(fc)
    W1, b1 = fc[0]
    d1 = W1.shape[0]
    # W1[h, c*t_last + t]  ->  w1_prep[t, c, h]
    w1_prep = jnp.transpose(W1.reshape(d1, c_last, t_last), (2, 1, 0))
    args += [w1_prep, b1.reshape(1, d1)]
    for (W, bfc) in fc[1:]:
        args += [W.T, bfc.reshape(1, -1)]              # torch Linear: y = x W^T + b

    out_dim = fc[-1][0].shape[0]
    kernel = make_fused_kernel(batch, tuple(conv_cfg), n_fc, use_bn, t_last)
    return pl.pallas_call(
        kernel,
        out_shape=jax.ShapeDtypeStruct((batch, out_dim), jnp.float32),
    )(*args)


# ----------------------------------------------------------------------------
# Pure-JAX reference mirroring the PyTorch forward (for correctness check)
# ----------------------------------------------------------------------------
def neuinv_forward_reference(x, params, hpar):
    timeBins, inp_chan = hpar['inputShape']
    h = x.reshape((-1, inp_chan, timeBins)).astype(jnp.float32)
    for (W, b), plk in zip(params['conv'], hpar['conv_block']['pool']):
        out = jax.lax.conv_general_dilated(
            h, W, window_strides=(1,), padding='VALID',
            dimension_numbers=('NCH', 'OIH', 'NCH'))
        out = out + b[None, :, None]
        Bn, C, T = out.shape
        tp = T // plk
        out = out[:, :, :tp * plk].reshape(Bn, C, tp, plk).max(axis=-1)
        h = jnp.maximum(out, 0.0)
    flat = h.reshape(h.shape[0], -1)
    if hpar['batch_norm_flat']:
        mean = flat.mean(axis=0, keepdims=True)
        var = ((flat - mean) ** 2).mean(axis=0, keepdims=True)
        flat = (flat - mean) / jnp.sqrt(var + 1e-5) * params['gamma'] + params['beta']
    hfc = flat
    for (W, b) in params['fc'][:-1]:
        hfc = jnp.maximum(hfc @ W.T + b, 0.0)
    Wl, bl = params['fc'][-1]
    return hfc @ Wl.T + bl


# ----------------------------------------------------------------------------
# Deterministic synthetic parameters with PyTorch-module shapes
# ----------------------------------------------------------------------------
def build_params(hpar, key):
    timeBins, inp_chan = hpar['inputShape']
    keys = iter(jax.random.split(key, 32))
    params = {'conv': [], 'fc': []}

    c_in, T = inp_chan, timeBins
    for c_out, K, plk in zip(hpar['conv_block']['filter'],
                             hpar['conv_block']['kernel'],
                             hpar['conv_block']['pool']):
        W = 0.1 * jax.random.normal(next(keys), (c_out, c_in, K), jnp.float32)
        b = 0.1 * jax.random.normal(next(keys), (c_out,), jnp.float32)
        params['conv'].append((W, b))
        T = (T - K + 1) // plk
        c_in = c_out
    flat_dim = c_in * T

    if hpar['batch_norm_flat']:
        params['gamma'] = 1.0 + 0.1 * jax.random.normal(next(keys), (flat_dim,), jnp.float32)
        params['beta'] = 0.1 * jax.random.normal(next(keys), (flat_dim,), jnp.float32)

    inp_dim = flat_dim
    for dim in hpar['fc_block']['dims']:
        W = 0.1 * jax.random.normal(next(keys), (dim, inp_dim), jnp.float32)
        b = 0.1 * jax.random.normal(next(keys), (dim,), jnp.float32)
        params['fc'].append((W, b))
        inp_dim = dim
    W = 0.1 * jax.random.normal(next(keys), (hpar['outputSize'], inp_dim), jnp.float32)
    b = 0.1 * jax.random.normal(next(keys), (hpar['outputSize'],), jnp.float32)
    params['fc'].append((W, b))
    return params, flat_dim


# ----------------------------------------------------------------------------
if __name__ == "__main__":
    hpar = {
        'inputShape': (16, 4),                   # (timeBins, inp_chan)
        'conv_block': {'filter': [8, 16], 'kernel': [3, 3], 'pool': [2, 2]},
        'batch_norm_flat': True,
        'fc_block': {'dims': [32], 'dropFrac': 0.0},
        'outputSize': 4,
    }

    key = jax.random.PRNGKey(0)
    k_par, k_x = jax.random.split(key)
    params, flat_dim = build_params(hpar, k_par)

    # Input consistent with forward(): x.view(-1, inp_chan, timeBins)
    x = jax.random.normal(k_x, (2, 4, 16), jnp.float32)

    y = neuinv_forward_pallas(x, params, hpar)
    y = jax.block_until_ready(y)

    y_ref = jax.block_until_ready(neuinv_forward_reference(x, params, hpar))
    assert y.shape == (2, hpar['outputSize']), y.shape
    np.testing.assert_allclose(np.asarray(y), np.asarray(y_ref), rtol=1e-4, atol=1e-4)

    print("KERNEL_OK")
</pallas_src>

<mosaic_0001>
module attributes {stable_mosaic.version = 11 : i64} {
  func.func @kernel(%arg0: memref<2x16x4xf32, #tpu.memory_space<vmem>>, %arg1: memref<3x4x8xf32, #tpu.memory_space<vmem>>, %arg2: memref<1x8xf32, #tpu.memory_space<vmem>>, %arg3: memref<7x13xf32, #tpu.memory_space<vmem>>, %arg4: memref<3x8x16xf32, #tpu.memory_space<vmem>>, %arg5: memref<1x16xf32, #tpu.memory_space<vmem>>, %arg6: memref<2x3xf32, #tpu.memory_space<vmem>>, %arg7: memref<2x16xf32, #tpu.memory_space<vmem>>, %arg8: memref<2x16xf32, #tpu.memory_space<vmem>>, %arg9: memref<2x16x32xf32, #tpu.memory_space<vmem>>, %arg10: memref<1x32xf32, #tpu.memory_space<vmem>>, %arg11: memref<32x4xf32, #tpu.memory_space<vmem>>, %arg12: memref<1x4xf32, #tpu.memory_space<vmem>>, %arg13: memref<2x4xf32, #tpu.memory_space<vmem>>) attributes {dimension_semantics = [], scalar_prefetch = 0 : i64, scratch_operands = 0 : i64, tpu.core_type = #tpu.core_type<tc>} {
    %c0 = arith.constant 0 : index
    %c0_0 = arith.constant 0 : index
    %c0_1 = arith.constant 0 : index
    %0 = vector.load %arg0[%c0, %c0_0, %c0_1] : memref<2x16x4xf32, #tpu.memory_space<vmem>>, vector<2x16x4xf32>
    %c0_2 = arith.constant 0 : index
    %c0_3 = arith.constant 0 : index
    %1 = vector.load %arg2[%c0_2, %c0_3] : memref<1x8xf32, #tpu.memory_space<vmem>>, vector<1x8xf32>
    %c0_4 = arith.constant 0 : index
    %c0_5 = arith.constant 0 : index
    %2 = vector.load %arg3[%c0_4, %c0_5] : memref<7x13xf32, #tpu.memory_space<vmem>>, vector<7x13xf32>
    %3 = vector.extract_strided_slice %0 {offsets = [0, 0, 0], sizes = [2, 14, 4], strides = [1, 1, 1]} : vector<2x16x4xf32> to vector<2x14x4xf32>
    %c0_6 = arith.constant 0 : index
    %c0_7 = arith.constant 0 : index
    %c0_8 = arith.constant 0 : index
    %4 = vector.load %arg1[%c0_6, %c0_7, %c0_8] : memref<3x4x8xf32, #tpu.memory_space<vmem>>, vector<1x4x8xf32>
    %5 = vector.shape_cast %4 : vector<1x4x8xf32> to vector<4x8xf32>
    %6 = vector.shape_cast %5 : vector<4x8xf32> to vector<1x4x8xf32>
    %7 = vector.shape_cast %6 : vector<1x4x8xf32> to vector<1x4x8xf32>
    %8 = vector.broadcast %7 : vector<1x4x8xf32> to vector<2x4x8xf32>
    "tpu.trace_start"() <{level = 10 : i32, message = "btc,bco->bto"}> : () -> ()
    %cst = arith.constant dense<0.000000e+00> : vector<2x14x8xf32>
    %9 = tpu.matmul %3, %8, %cst {dimension_numbers = #tpu.dot_dimension_numbers<[2], [1], [1], [2], [0, 0, 0, 1, 1, 2], [0], [0]>} : vector<2x14x4xf32>, vector<2x4x8xf32>, vector<2x14x8xf32> -> vector<2x14x8xf32>
    "tpu.trace_stop"() : () -> ()
    %10 = vector.extract_strided_slice %0 {offsets = [0, 1, 0], sizes = [2, 14, 4], strides = [1, 1, 1]} : vector<2x16x4xf32> to vector<2x14x4xf32>
    %c1 = arith.constant 1 : index
    %c0_9 = arith.constant 0 : index
    %c0_10 = arith.constant 0 : index
    %11 = vector.load %arg1[%c1, %c0_9, %c0_10] : memref<3x4x8xf32, #tpu.memory_space<vmem>>, vector<1x4x8xf32>
    %12 = vector.shape_cast %11 : vector<1x4x8xf32> to vector<4x8xf32>
    %13 = vector.shape_cast %12 : vector<4x8xf32> to vector<1x4x8xf32>
    %14 = vector.shape_cast %13 : vector<1x4x8xf32> to vector<1x4x8xf32>
    %15 = vector.broadcast %14 : vector<1x4x8xf32> to vector<2x4x8xf32>
    "tpu.trace_start"() <{level = 10 : i32, message = "btc,bco->bto"}> : () -> ()
    %cst_11 = arith.constant dense<0.000000e+00> : vector<2x14x8xf32>
    %16 = tpu.matmul %10, %15, %cst_11 {dimension_numbers = #tpu.dot_dimension_numbers<[2], [1], [1], [2], [0, 0, 0, 1, 1, 2], [0], [0]>} : vector<2x14x4xf32>, vector<2x4x8xf32>, vector<2x14x8xf32> -> vector<2x14x8xf32>
    "tpu.trace_stop"() : () -> ()
    %17 = arith.addf %9, %16 : vector<2x14x8xf32>
    %18 = vector.extract_strided_slice %0 {offsets = [0, 2, 0], sizes = [2, 14, 4], strides = [1, 1, 1]} : vector<2x16x4xf32> to vector<2x14x4xf32>
    %c2 = arith.constant 2 : index
    %c0_12 = arith.constant 0 : index
    %c0_13 = arith.constant 0 : index
    %19 = vector.load %arg1[%c2, %c0_12, %c0_13] : memref<3x4x8xf32, #tpu.memory_space<vmem>>, vector<1x4x8xf32>
    %20 = vector.shape_cast %19 : vector<1x4x8xf32> to vector<4x8xf32>
    %21 = vector.shape_cast %20 : vector<4x8xf32> to vector<1x4x8xf32>
    %22 = vector.shape_cast %21 : vector<1x4x8xf32> to vector<1x4x8xf32>
    %23 = vector.broadcast %22 : vector<1x4x8xf32> to vector<2x4x8xf32>
    "tpu.trace_start"() <{level = 10 : i32, message = "btc,bco->bto"}> : () -> ()
    %cst_14 = arith.constant dense<0.000000e+00> : vector<2x14x8xf32>
    %24 = tpu.matmul %18, %23, %cst_14 {dimension_numbers = #tpu.dot_dimension_numbers<[2], [1], [1], [2], [0, 0, 0, 1, 1, 2], [0], [0]>} : vector<2x14x4xf32>, vector<2x4x8xf32>, vector<2x14x8xf32> -> vector<2x14x8xf32>
    "tpu.trace_stop"() : () -> ()
    %25 = arith.addf %17, %24 : vector<2x14x8xf32>
    %26 = vector.shape_cast %1 : vector<1x8xf32> to vector<1x1x8xf32>
    %27 = vector.broadcast %26 : vector<1x1x8xf32> to vector<2x14x8xf32>
    %28 = arith.addf %25, %27 : vector<2x14x8xf32>
    %29 = vector.extract_strided_slice %28 {offsets = [0, 0, 0], sizes = [2, 13, 8], strides = [1, 1, 1]} : vector<2x14x8xf32> to vector<2x13x8xf32>
    %30 = vector.extract_strided_slice %28 {offsets = [0, 1, 0], sizes = [2, 13, 8], strides = [1, 1, 1]} : vector<2x14x8xf32> to vector<2x13x8xf32>
    %31 = arith.maximumf %29, %30 : vector<2x13x8xf32>
    %32 = vector.shape_cast %2 : vector<7x13xf32> to vector<1x7x13xf32>
    %33 = vector.shape_cast %32 : vector<1x7x13xf32> to vector<1x7x13xf32>
    %34 = vector.broadcast %33 : vector<1x7x13xf32> to vector<2x7x13xf32>
    "tpu.trace_start"() <{level = 10 : i32, message = "bpt,btc->bpc"}> : () -> ()
    %cst_15 = arith.constant dense<0.000000e+00> : vector<2x7x8xf32>
    %35 = tpu.matmul %34, %31, %cst_15 {dimension_numbers = #tpu.dot_dimension_numbers<[2], [1], [1], [2], [0, 0, 0, 1, 1, 2], [0], [0]>} : vector<2x7x13xf32>, vector<2x13x8xf32>, vector<2x7x8xf32> -> vector<2x7x8xf32>
    "tpu.trace_stop"() : () -> ()
    %cst_16 = arith.constant 0.000000e+00 : f32
    %36 = vector.broadcast %cst_16 : f32 to vector<2x7x8xf32>
    %37 = arith.maximumf %35, %36 : vector<2x7x8xf32>
    %c0_17 = arith.constant 0 : index
    %c0_18 = arith.constant 0 : index
    %38 = vector.load %arg5[%c0_17, %c0_18] : memref<1x16xf32, #tpu.memory_space<vmem>>, vector<1x16xf32>
    %c0_19 = arith.constant 0 : index
    %c0_20 = arith.constant 0 : index
    %39 = vector.load %arg6[%c0_19, %c0_20] : memref<2x3xf32, #tpu.memory_space<vmem>>, vector<2x3xf32>
    %40 = vector.extract_strided_slice %37 {offsets = [0, 0, 0], sizes = [2, 5, 8], strides = [1, 1, 1]} : vector<2x7x8xf32> to vector<2x5x8xf32>
    %c0_21 = arith.constant 0 : index
    %c0_22 = arith.constant 0 : index
    %c0_23 = arith.constant 0 : index
    %41 = vector.load %arg4[%c0_21, %c0_22, %c0_23] : memref<3x8x16xf32, #tpu.memory_space<vmem>>, vector<1x8x16xf32>
    %42 = vector.shape_cast %41 : vector<1x8x16xf32> to vector<8x16xf32>
    %43 = vector.shape_cast %42 : vector<8x16xf32> to vector<1x8x16xf32>
    %44 = vector.shape_cast %43 : vector<1x8x16xf32> to vector<1x8x16xf32>
    %45 = vector.broadcast %44 : vector<1x8x16xf32> to vector<2x8x16xf32>
    "tpu.trace_start"() <{level = 10 : i32, message = "btc,bco->bto"}> : () -> ()
    %cst_24 = arith.constant dense<0.000000e+00> : vector<2x5x16xf32>
    %46 = tpu.matmul %40, %45, %cst_24 {dimension_numbers = #tpu.dot_dimension_numbers<[2], [1], [1], [2], [0, 0, 0, 1, 1, 2], [0], [0]>} : vector<2x5x8xf32>, vector<2x8x16xf32>, vector<2x5x16xf32> -> vector<2x5x16xf32>
    "tpu.trace_stop"() : () -> ()
    %47 = vector.extract_strided_slice %37 {offsets = [0, 1, 0], sizes = [2, 5, 8], strides = [1, 1, 1]} : vector<2x7x8xf32> to vector<2x5x8xf32>
    %c1_25 = arith.constant 1 : index
    %c0_26 = arith.constant 0 : index
    %c0_27 = arith.constant 0 : index
    %48 = vector.load %arg4[%c1_25, %c0_26, %c0_27] : memref<3x8x16xf32, #tpu.memory_space<vmem>>, vector<1x8x16xf32>
    %49 = vector.shape_cast %48 : vector<1x8x16xf32> to vector<8x16xf32>
    %50 = vector.shape_cast %49 : vector<8x16xf32> to vector<1x8x16xf32>
    %51 = vector.shape_cast %50 : vector<1x8x16xf32> to vector<1x8x16xf32>
    %52 = vector.broadcast %51 : vector<1x8x16xf32> to vector<2x8x16xf32>
    "tpu.trace_start"() <{level = 10 : i32, message = "btc,bco->bto"}> : () -> ()
    %cst_28 = arith.constant dense<0.000000e+00> : vector<2x5x16xf32>
    %53 = tpu.matmul %47, %52, %cst_28 {dimension_numbers = #tpu.dot_dimension_numbers<[2], [1], [1], [2], [0, 0, 0, 1, 1, 2], [0], [0]>} : vector<2x5x8xf32>, vector<2x8x16xf32>, vector<2x5x16xf32> -> vector<2x5x16xf32>
    "tpu.trace_stop"() : () -> ()
    %54 = arith.addf %46, %53 : vector<2x5x16xf32>
    %55 = vector.extract_strided_slice %37 {offsets = [0, 2, 0], sizes = [2, 5, 8], strides = [1, 1, 1]} : vector<2x7x8xf32> to vector<2x5x8xf32>
    %c2_29 = arith.constant 2 : index
    %c0_30 = arith.constant 0 : index
    %c0_31 = arith.constant 0 : index
    %56 = vector.load %arg4[%c2_29, %c0_30, %c0_31] : memref<3x8x16xf32, #tpu.memory_space<vmem>>, vector<1x8x16xf32>
    %57 = vector.shape_cast %56 : vector<1x8x16xf32> to vector<8x16xf32>
    %58 = vector.shape_cast %57 : vector<8x16xf32> to vector<1x8x16xf32>
    %59 = vector.shape_cast %58 : vector<1x8x16xf32> to vector<1x8x16xf32>
    %60 = vector.broadcast %59 : vector<1x8x16xf32> to vector<2x8x16xf32>
    "tpu.trace_start"() <{level = 10 : i32, message = "btc,bco->bto"}> : () -> ()
    %cst_32 = arith.constant dense<0.000000e+00> : vector<2x5x16xf32>
    %61 = tpu.matmul %55, %60, %cst_32 {dimension_numbers = #tpu.dot_dimension_numbers<[2], [1], [1], [2], [0, 0, 0, 1, 1, 2], [0], [0]>} : vector<2x5x8xf32>, vector<2x8x16xf32>, vector<2x5x16xf32> -> vector<2x5x16xf32>
    "tpu.trace_stop"() : () -> ()
    %62 = arith.addf %54, %61 : vector<2x5x16xf32>
    %63 = vector.shape_cast %38 : vector<1x16xf32> to vector<1x1x16xf32>
    %64 = vector.broadcast %63 : vector<1x1x16xf32> to vector<2x5x16xf32>
    %65 = arith.addf %62, %64 : vector<2x5x16xf32>
    %66 = vector.extract_strided_slice %65 {offsets = [0, 0, 0], sizes = [2, 3, 16], strides = [1, 1, 1]} : vector<2x5x16xf32> to vector<2x3x16xf32>
    %67 = vector.extract_strided_slice %65 {offsets = [0, 1, 0], sizes = [2, 3, 16], strides = [1, 1, 1]} : vector<2x5x16xf32> to vector<2x3x16xf32>
    %68 = arith.maximumf %66, %67 : vector<2x3x16xf32>
    %69 = vector.shape_cast %39 : vector<2x3xf32> to vector<1x2x3xf32>
    %70 = vector.shape_cast %69 : vector<1x2x3xf32> to vector<1x2x3xf32>
    %71 = vector.broadcast %70 : vector<1x2x3xf32> to vector<2x2x3xf32>
    "tpu.trace_start"() <{level = 10 : i32, message = "bpt,btc->bpc"}> : () -> ()
    %cst_33 = arith.constant dense<0.000000e+00> : vector<2x2x16xf32>
    %72 = tpu.matmul %71, %68, %cst_33 {dimension_numbers = #tpu.dot_dimension_numbers<[2], [1], [1], [2], [0, 0, 0, 1, 1, 2], [0], [0]>} : vector<2x2x3xf32>, vector<2x3x16xf32>, vector<2x2x16xf32> -> vector<2x2x16xf32>
    "tpu.trace_stop"() : () -> ()
    %cst_34 = arith.constant 0.000000e+00 : f32
    %73 = vector.broadcast %cst_34 : f32 to vector<2x2x16xf32>
    %74 = arith.maximumf %72, %73 : vector<2x2x16xf32>
    %c0_35 = arith.constant 0 : index
    %c0_36 = arith.constant 0 : index
    %75 = vector.load %arg7[%c0_35, %c0_36] : memref<2x16xf32, #tpu.memory_space<vmem>>, vector<2x16xf32>
    %c0_37 = arith.constant 0 : index
    %c0_38 = arith.constant 0 : index
    %76 = vector.load %arg8[%c0_37, %c0_38] : memref<2x16xf32, #tpu.memory_space<vmem>>, vector<2x16xf32>
    %cst_39 = arith.constant dense<0.000000e+00> : vector<2x16xf32>
    %77 = vector.multi_reduction <add>, %74, %cst_39 [0] : vector<2x2x16xf32> to vector<2x16xf32>
    %78 = vector.shape_cast %77 : vector<2x16xf32> to vector<1x2x16xf32>
    %cst_40 = arith.constant 2.000000e+00 : f32
    %79 = vector.broadcast %cst_40 : f32 to vector<1x2x16xf32>
    %80 = arith.divf %78, %79 : vector<1x2x16xf32>
    %81 = vector.broadcast %80 : vector<1x2x16xf32> to vector<2x2x16xf32>
    %82 = arith.subf %74, %81 : vector<2x2x16xf32>
    %83 = arith.mulf %82, %82 : vector<2x2x16xf32>
    %cst_41 = arith.constant dense<0.000000e+00> : vector<2x16xf32>
    %84 = vector.multi_reduction <add>, %83, %cst_41 [0] : vector<2x2x16xf32> to vector<2x16xf32>
    %85 = vector.shape_cast %84 : vector<2x16xf32> to vector<1x2x16xf32>
    %cst_42 = arith.constant 2.000000e+00 : f32
    %86 = vector.broadcast %cst_42 : f32 to vector<1x2x16xf32>
    %87 = arith.divf %85, %86 : vector<1x2x16xf32>
    %88 = vector.broadcast %80 : vector<1x2x16xf32> to vector<2x2x16xf32>
    %89 = arith.subf %74, %88 : vector<2x2x16xf32>
    %cst_43 = arith.constant 9.99999974E-6 : f32
    %90 = vector.broadcast %cst_43 : f32 to vector<1x2x16xf32>
    %91 = arith.addf %87, %90 : vector<1x2x16xf32>
    %92 = math.rsqrt %91 : vector<1x2x16xf32>
    %93 = vector.broadcast %92 : vector<1x2x16xf32> to vector<2x2x16xf32>
    %94 = arith.mulf %89, %93 : vector<2x2x16xf32>
    %95 = vector.shape_cast %75 : vector<2x16xf32> to vector<1x2x16xf32>
    %96 = vector.broadcast %95 : vector<1x2x16xf32> to vector<2x2x16xf32>
    %97 = arith.mulf %94, %96 : vector<2x2x16xf32>
    %98 = vector.shape_cast %76 : vector<2x16xf32> to vector<1x2x16xf32>
    %99 = vector.broadcast %98 : vector<1x2x16xf32> to vector<2x2x16xf32>
    %100 = arith.addf %97, %99 : vector<2x2x16xf32>
    %c0_44 = arith.constant 0 : index
    %c0_45 = arith.constant 0 : index
    %101 = vector.load %arg10[%c0_44, %c0_45] : memref<1x32xf32, #tpu.memory_space<vmem>>, vector<1x32xf32>
    %102 = vector.extract_strided_slice %100 {offsets = [0, 0, 0], sizes = [2, 1, 16], strides = [1, 1, 1]} : vector<2x2x16xf32> to vector<2x1x16xf32>
    %103 = vector.shape_cast %102 : vector<2x1x16xf32> to vector<2x16xf32>
    %c0_46 = arith.constant 0 : index
    %c0_47 = arith.constant 0 : index
    %c0_48 = arith.constant 0 : index
    %104 = vector.load %arg9[%c0_46, %c0_47, %c0_48] : memref<2x16x32xf32, #tpu.memory_space<vmem>>, vector<1x16x32xf32>
    %105 = vector.shape_cast %104 : vector<1x16x32xf32> to vector<16x32xf32>
    %cst_49 = arith.constant dense<0.000000e+00> : vector<2x32xf32>
    %106 = tpu.matmul %103, %105, %cst_49 {dimension_numbers = #tpu.dot_dimension_numbers<[1], [0], [0], [1], [0, 0, 1, 1], [], []>} : vector<2x16xf32>, vector<16x32xf32>, vector<2x32xf32> -> vector<2x32xf32>
    %107 = vector.extract_strided_slice %100 {offsets = [0, 1, 0], sizes = [2, 1, 16], strides = [1, 1, 1]} : vector<2x2x16xf32> to vector<2x1x16xf32>
    %108 = vector.shape_cast %107 : vector<2x1x16xf32> to vector<2x16xf32>
    %c1_50 = arith.constant 1 : index
    %c0_51 = arith.constant 0 : index
    %c0_52 = arith.constant 0 : index
    %109 = vector.load %arg9[%c1_50, %c0_51, %c0_52] : memref<2x16x32xf32, #tpu.memory_space<vmem>>, vector<1x16x32xf32>
    %110 = vector.shape_cast %109 : vector<1x16x32xf32> to vector<16x32xf32>
    %cst_53 = arith.constant dense<0.000000e+00> : vector<2x32xf32>
    %111 = tpu.matmul %108, %110, %cst_53 {dimension_numbers = #tpu.dot_dimension_numbers<[1], [0], [0], [1], [0, 0, 1, 1], [], []>} : vector<2x16xf32>, vector<16x32xf32>, vector<2x32xf32> -> vector<2x32xf32>
    %112 = arith.addf %106, %111 : vector<2x32xf32>
    %113 = vector.broadcast %101 : vector<1x32xf32> to vector<2x32xf32>
    %114 = arith.addf %112, %113 : vector<2x32xf32>
    %cst_54 = arith.constant 0.000000e+00 : f32
    %115 = vector.broadcast %cst_54 : f32 to vector<2x32xf32>
    %116 = arith.maximumf %114, %115 : vector<2x32xf32>
    %c0_55 = arith.constant 0 : index
    %c0_56 = arith.constant 0 : index
    %117 = vector.load %arg11[%c0_55, %c0_56] : memref<32x4xf32, #tpu.memory_space<vmem>>, vector<32x4xf32>
    %c0_57 = arith.constant 0 : index
    %c0_58 = arith.constant 0 : index
    %118 = vector.load %arg12[%c0_57, %c0_58] : memref<1x4xf32, #tpu.memory_space<vmem>>, vector<1x4xf32>
    %cst_59 = arith.constant dense<0.000000e+00> : vector<2x4xf32>
    %119 = tpu.matmul %116, %117, %cst_59 {dimension_numbers = #tpu.dot_dimension_numbers<[1], [0], [0], [1], [0, 0, 1, 1], [], []>} : vector<2x32xf32>, vector<32x4xf32>, vector<2x4xf32> -> vector<2x4xf32>
    %120 = vector.broadcast %118 : vector<1x4xf32> to vector<2x4xf32>
    %121 = arith.addf %119, %120 : vector<2x4xf32>
    %c0_60 = arith.constant 0 : index
    %c0_61 = arith.constant 0 : index
    %122 = vector.load %arg13[%c0_60, %c0_61] : memref<2x4xf32, #tpu.memory_space<vmem>>, vector<2x4xf32>
    tpu.vector_store %arg13[%c0_60, %c0_61], %121 {strides = array<i32>} : memref<2x4xf32, #tpu.memory_space<vmem>>, vector<2x4xf32>,
    return
  }
}

</mosaic_0001>

<bundles_post_ra>
// kernel: tpu_custom_call.1
= control target key start
LH: loop header
LB: loop body
LE: loop exit
PB: predicated region body
PF: predicated region fallthrough
CT: control target
= control target key end

     0   :  { %vm65_vm0 = vcmask 1043456   ;;  %vm60_vm1 = vcmask 31744   ;;  %vm56_vm2 = vcmask 1046528   ;;  %vm391_vm3 = vcmask 1045504   ;;  %s2169_s0 = inlined_call_operand.vmem [shape: f32[2,16,4], index: 0, kind: input, shape index: {}]   ;;  %s2170_s1 = inlined_call_operand.vmem [shape: f32[3,4,8], index: 1, kind: input, shape index: {}]   ;;  %s2171_s2 = inlined_call_operand.vmem [shape: f32[1,8], index: 2, kind: input, shape index: {}]   ;;  %s2172_s3 = inlined_call_operand.vmem [shape: f32[7,13], index: 3, kind: input, shape index: {}]   ;;  %s2173_s4 = inlined_call_operand.vmem [shape: f32[3,8,16], index: 4, kind: input, shape index: {}]   ;;  %s2174_s5 = inlined_call_operand.vmem [shape: f32[1,16], index: 5, kind: input, shape index: {}]   ;;  %s2175_s6 = inlined_call_operand.vmem [shape: f32[2,3], index: 6, kind: input, shape index: {}]   ;;  %s2176_s7 = inlined_call_operand.vmem [shape: f32[2,16], index: 7, kind: input, shape index: {}]   ;;  %s2177_s8 = inlined_call_operand.vmem [shape: f32[2,16], index: 8, kind: input, shape index: {}]   ;;  %s2178_s9 = inlined_call_operand.vmem [shape: f32[2,16,32], index: 9, kind: input, shape index: {}]   ;;  %s2179_s10 = inlined_call_operand.vmem [shape: f32[1,32], index: 10, kind: input, shape index: {}]   ;;  %s2180_s11 = inlined_call_operand.vmem [shape: f32[32,4], index: 11, kind: input, shape index: {}]   ;;  %s2181_s12 = inlined_call_operand.vmem [shape: f32[1,4], index: 12, kind: input, shape index: {}]   ;;  %s2182_s13 = inlined_call_operand.hbm [shape: f32[2,4], index: 13, kind: output, shape index: {}]  }
   0x1   :  { %v51_v0 = vld [vmem:[%s2170_s1] sm:$0xf]  ;;  %v46_v2 = vld [vmem:[%s2169_s0 + $0x8] sm:$0xff]  ;;  %v1652_v5 = vld [vmem:[%s2170_s1 + $0x4] sm:$0xf] }
   0x2   :  { %v45_v1 = vld [vmem:[%s2169_s0] sm:$0xff]  ;;  %1758 = vmatprep.subr.msk.mxu0 %vm65_vm0, %v51_v0  ;;  %v393_v6 = vrot.slane %v46_v2, 2  ;;  %1748 = vmatprep.subr.msk.mxu1 %vm65_vm0, %v1652_v5  ;;  %v58_v7 = vrot.slane %v46_v2, 1  ;;  %v47_v8 = vld [vmem:[%s2169_s0 + $0x10] sm:$0xff]  ;;  %v48_v9 = vld [vmem:[%s2169_s0 + $0x18] sm:$0xff] }
   0x3   :  { %v57_v3 = vrot.slane %v45_v1, 1  ;;  %1760 = vmatprep.mubr.msk.f32.mxu0 %vm60_vm1, %v45_v1  ;;  %v392_v4 = vrot.slane %v45_v1, 2  ;;  %1759 = vmatpush3.msk.msra.mxu0 %vm65_vm0, %v51_v0  ;;  %v1665_v10 = vld [vmem:[%s2170_s1 + $0x8] sm:$0xf]  ;;  %v146_v11 = vrot.slane %v47_v8, 1  ;;  %v147_v12 = vrot.slane %v48_v9, 1 }
   0x4   :  { %1761 = vmatmul.mubr.msk.f32.vlgmr.msra.gmra.mrb[0].mxu0 %vm60_vm1, %v46_v2  ;;  %1749 = vmatpush3.msk.msra.mxu1 %vm65_vm0, %v1652_v5 }
   0x5   :  { %v394_v13 = vsel %vm391_vm3, %v392_v4, %v393_v6 }
   0x6   :  { %18 = vsyncpa [#allocation3], 0  ;;  %v59_v14 = vsel %vm56_vm2, %v57_v3, %v58_v7  ;;  %1753 = vmatprep.subr.msk.mxu1 %vm65_vm0, %v1652_v5  ;;  %1768 = vmatprep.subr.msk.mxu0 %vm65_vm0, %v1665_v10  ;;  %v148_v15 = vsel %vm56_vm2, %v146_v11, %v147_v12  ;;  %v477_v16 = vrot.slane %v47_v8, 2  ;;  %v478_v17 = vrot.slane %v48_v9, 2  ;;  %v1672_v23 = vld [vmem:[%s2171_s2] ss:$0 sm:$0xff] }
   0x7   :  { %1750 = vmatprep.mubr.msk.f32.mxu1 %vm60_vm1, %v59_v14  ;;  %1769 = vmatpush3.msk.msra.mxu0 %vm65_vm0, %v1665_v10  ;;  %v1916_v19 = vmov 0.0|0.0   ;;  %vm1917_vm4 = vmmov 0   ;;  %v1918_v20 = vmov 0.0   ;;  %vm595_vm5 = vcmask 1044480   ;;  %v50_v37 = vld [vmem:[%s2172_s3] sm:$0x7f] }
   0x8   :  { %1751 = vmatmul.mubr.msk.f32.vlgmr.msra.gmra.mrb[0].mxu1 %vm60_vm1, %v58_v7  ;;  %1770 = vmatprep.mubr.msk.f32.mxu0 %vm60_vm1, %v394_v13  ;;  %v479_v18 = vsel %vm391_vm3, %v477_v16, %v478_v17  ;;  %vm1919_vm6 = vmmov 1   ;;  %vm591_vm8 = vcmask 105472   ;;  %v1677_v48 = vld [vmem:[%s2173_s4 + $0x8] sm:$0xff]  ;;  %vm751_vm9 = vcmask 64512   ;;  %v746_v53 = vld [vmem:[%s2173_s4] sm:$0xff]  ;;  %v1682_v54 = vld [vmem:[%s2173_s4 + $0x10] sm:$0xff] }
   0x9   :  { %1754 = vmatpush3.msk.msra.mxu1 %vm65_vm0, %v1652_v5  ;;  %1755 = vmatprep.mubr.msk.f32.mxu1 %vm60_vm1, %v148_v15  ;;  %vm2050_vm7 = vmpackc.low %vm595_vm5, %vm1919_vm6  ;;  %v1685_v2 = vld [vmem:[%s2174_s5] ss:$0 sm:$0xff]  ;;  %vm1212_vm10 = vcmask 1042432   ;;  %vm1208_vm11 = vcmask 23552   ;;  %vm1363_vm12 = vcmask 123904   ;;  %vm1394_vm13 = vcmask 1041409  }
   0xa   :  { %1763 = vmatprep.subr.msk.mxu1 %vm65_vm0, %v51_v0  ;;  %1857 = vmatprep.subr.bf16.mxu0 %v1916_v19  ;;  %v745_v11 = vld [vmem:[%s2175_s6] sm:$0x3]  ;;  %vm1396_vm14 = vcmask 130048   ;;  %vm1562_vm15 = vcmask 261120  }
   0xc   :  { %1756 = vmatmul.mubr.msk.f32.vlgmr.msra.gmra.mrb[2].mxu1 %vm60_vm1, %v147_v12  ;;  %1771 = vmatmul.mubr.msk.f32.vlgmr.msra.gmra.mrb[0].mxu0 %vm60_vm1, %v393_v6 }
   0xd   :  { %1764 = vmatpush3.msk.msra.mxu1 %vm65_vm0, %v51_v0  ;;  %1765 = vmatprep.mubr.msk.f32.mxu1 %vm60_vm1, %v47_v8 }
   0xe   :  { %1773 = vmatprep.subr.msk.mxu1 %vm65_vm0, %v1665_v10  ;;  %1782 = vmatprep.mubr.msk.f32.mxu0 %vm1917_vm4, %v1918_v20 }
  0x14   :  { %1766 = vmatmul.mubr.msk.f32.vlgmr.msra.gmra.mrb[2].mxu1 %vm60_vm1, %v48_v9 }
  0x15   :  { %1774 = vmatpush3.msk.msra.mxu1 %vm65_vm0, %v1665_v10  ;;  %1775 = vmatprep.mubr.msk.f32.mxu1 %vm60_vm1, %v479_v18  ;;  %vm1636_vm0 = vcmask 25600  }
  0x16   :  { %1861 = vmatprep.subr.bf16.mxu1 %v1916_v19 }
  0x1c   :  { %1776 = vmatmul.mubr.msk.f32.vlgmr.msra.gmra.mrb[2].mxu1 %vm60_vm1, %v478_v17 }
  0x1d   :  { %1789 = vmatprep.mubr.msk.f32.mxu1 %vm1917_vm4, %v1918_v20 }
  0xdb   :  { %v1752_v21 = vpop.f32.mrb[0].mxu1 }
  0xdc   :  { %v135_v22 = vpop.f32.mrb[1].mxu1 }
  0xdf   :  { %v1772_v24 = vpop.f32.mrb[0].mxu0 }
  0xe0   :  { %v1877_v25 = vadd.f32 %v1772_v24, %v1752_v21  ;;  %v468_v26 = vpop.f32.mrb[1].mxu0  ;;  %v1691_v24 = vld [vmem:[%s2178_s9 + $0x18] sm:$0xff] }
  0xe1   :  { %v1878_v27 = vadd.f32 %v468_v26, %v135_v22 }
  0xe2   :  { %v570_v28 = vadd.f32 %v1877_v25, %v1672_v23  ;;  %v1386_v25 = vld [vmem:[%s2178_s9] sm:$0xff] }
  0xe3   :  { %v569_v29 = vadd.f32 %v1878_v27, %v1672_v23  ;;  %v1387_v27 = vld [vmem:[%s2178_s9 + $0x8] sm:$0xff] }
  0xe4   :  { %v578_v30 = vrot.slane %v570_v28, 1 }
  0xe5   :  { %v577_v31 = vrot.slane %v569_v29, 1 }
  0xe6   :  { %v588_v33 = vmax.f32 %v570_v28, %v578_v30  ;;  %v1869_v28 = vpack.c.bf16 %v1387_v27, %v1386_v25 }
  0xe7   :  { %v579_v32 = vsel %vm56_vm2, %v577_v31, %v578_v30 }
  0xe8   :  { %v587_v34 = vmax.f32 %v569_v29, %v579_v32 }
  0xea   :  { %v1858_v36 = vpack.c.bf16 %v588_v33, %v587_v34 }
  0xec   :  { %1860 = vmatpush3.bf16.msk.msra.mxu0 %vm2050_vm7, %v1858_v36 }
  0xed   :  { %1792 = vmatprep.subr.mxu0 %v1918_v20 }
  0xef   :  { %v1777_v38 = vpop.f32.mrb[2].mxu1  ;;  %1783 = vmatmul.mubr.msk.f32.vlgmr.msra.gmra.mrb[2].mxu0 %vm591_vm8, %v50_v37 }
  0xf0   :  { %v572_v39 = vadd.f32 %v1777_v38, %v1672_v23  ;;  %v550_v40 = vpop.f32.mrb[3].mxu1  ;;  %1794 = vmatprep.mubr.msk.f32.mxu0 %vm1917_vm4, %v1918_v20  ;;  %1793 = vmatpush3.msra.mxu0 %v1677_v48 }
  0xf1   :  { %v571_v41 = vadd.f32 %v1672_v23, %v550_v40  ;;  %1802 = vmatprep.subr.mxu0 %v1918_v20  ;;  %v1690_v23 = vld [vmem:[%s2178_s9 + $0x10] sm:$0xff] }
  0xf2   :  { %v581_v42 = vrot.slane %v572_v39, 1  ;;  %v1866_v26 = vpack.c.bf16 %v1691_v24, %v1690_v23 }
  0xf3   :  { %v580_v43 = vrot.slane %v571_v41, 1 }
  0xf4   :  { %v590_v45 = vmax.f32 %v572_v39, %v581_v42 }
  0xf5   :  { %v582_v44 = vsel %vm56_vm2, %v580_v43, %v581_v42 }
  0xf6   :  { %v589_v46 = vmax.f32 %v571_v41, %v582_v44 }
  0xf8   :  { %v1862_v47 = vpack.c.bf16 %v590_v45, %v589_v46 }
  0xfa   :  { %1864 = vmatpush3.bf16.msk.msra.mxu1 %vm2050_vm7, %v1862_v47 }
  0xfb   :  { %1797 = vmatprep.subr.mxu1 %v1918_v20 }
  0xfd   :  { %1790 = vmatmul.mubr.msk.f32.vlgmr.msra.gmra.mrb[4].mxu1 %vm591_vm8, %v50_v37 }
  0xfe   :  { %1799 = vmatprep.mubr.msk.f32.mxu1 %vm1917_vm4, %v1918_v20  ;;  %1798 = vmatpush3.msra.mxu1 %v1677_v48 }
  0xff   :  { %1807 = vmatprep.subr.mxu1 %v1918_v20 }
 0x1c2   :  { %v665_v49 = vpop.f32.mrb[2].mxu0 }
 0x1c3   :  { %v742_v50 = vmax.f32 %v665_v49, 0.0  ;;  %v1784_v51 = vpop.f32.mrb[3].mxu0  ;;  %v1361_v49 = vld [vmem:[%s2176_s7] sm:$0x3] }
 0x1c5   :  { %v750_v52 = vrot.slane %v742_v50, 1  ;;  %v1044_v55 = vrot.slane %v742_v50, 2 }
 0x1c7   :  { %1795 = vmatmul.mubr.msk.f32.vlgmr.msra.gmra.mrb[4].mxu0 %vm751_vm9, %v750_v52  ;;  %v1362_v52 = vld [vmem:[%s2177_s8] sm:$0x3] }
 0x1c8   :  { %1803 = vmatpush3.msra.mxu0 %v746_v53  ;;  %1804 = vmatprep.mubr.msk.f32.mxu0 %vm1917_vm4, %v1918_v20 }
 0x1c9   :  { %1812 = vmatprep.subr.mxu0 %v1918_v20 }
 0x1cb   :  { %1805 = vmatmul.mubr.msk.f32.vlgmr.msra.gmra.mrb[6].mxu0 %vm751_vm9, %v742_v50 }
 0x1cc   :  { %1813 = vmatpush3.msra.mxu0 %v1682_v54  ;;  %1814 = vmatprep.mubr.msk.f32.mxu0 %vm1917_vm4, %v1918_v20 }
 0x1cd   :  { %1822 = vmatprep.subr.mxu0 %v1918_v20 }
 0x1cf   :  { %1815 = vmatmul.mubr.msk.f32.vlgmr.msra.gmra.mrb[8].mxu0 %vm751_vm9, %v1044_v55 }
 0x1d0   :  { %v738_v56 = vpop.f32.mrb[4].mxu1  ;;  %1824 = vmatprep.mubr.msk.f32.mxu0 %vm1917_vm4, %v1918_v20 }
 0x1d1   :  { %v743_v57 = vmax.f32 %v738_v56, 0.0  ;;  %v1791_v58 = vpop.f32.mrb[5].mxu1 }
 0x1d3   :  { %v825_v59 = vrot.slane %v743_v57, 1  ;;  %v1117_v60 = vrot.slane %v743_v57, 2 }
 0x1d5   :  { %1800 = vmatmul.mubr.msk.f32.vlgmr.msra.gmra.mrb[6].mxu1 %vm751_vm9, %v825_v59 }
 0x1d6   :  { %1808 = vmatpush3.msra.mxu1 %v746_v53  ;;  %1809 = vmatprep.mubr.msk.f32.mxu1 %vm1917_vm4, %v1918_v20 }
 0x1d7   :  { %1817 = vmatprep.subr.mxu1 %v1918_v20 }
 0x1d9   :  { %1810 = vmatmul.mubr.msk.f32.vlgmr.msra.gmra.mrb[8].mxu1 %vm751_vm9, %v743_v57 }
 0x1da   :  { %1818 = vmatpush3.msra.mxu1 %v1682_v54  ;;  %1819 = vmatprep.mubr.msk.f32.mxu1 %vm1917_vm4, %v1918_v20 }
 0x1db   :  { %1827 = vmatprep.subr.mxu1 %v1918_v20 }
 0x1dd   :  { %1820 = vmatmul.mubr.msk.f32.vlgmr.msra.gmra.mrb[10].mxu1 %vm751_vm9, %v1117_v60 }
 0x1de   :  { %1829 = vmatprep.mubr.msk.f32.mxu1 %vm1917_vm4, %v1918_v20 }
 0x29a   :  { %v820_v61 = vpop.f32.mrb[4].mxu0 }
 0x29b   :  { %v1796_v62 = vpop.f32.mrb[5].mxu0 }
 0x29c   :  { %v1552_v62 = vld [vmem:[%s2180_s11 + $0x8] sm:$0xff] }
 0x29e   :  { %v966_v63 = vpop.f32.mrb[6].mxu0 }
 0x29f   :  { %v967_v0 = vadd.f32 %v966_v63, %v820_v61  ;;  %v1806_v1 = vpop.f32.mrb[7].mxu0  ;;  %v1551_v61 = vld [vmem:[%s2180_s11] sm:$0xff] }
 0x2a0   :  { %v1872_v63 = vpack.c.bf16 %v1552_v62, %v1551_v61 }
 0x2a2   :  { %v1113_v3 = vpop.f32.mrb[8].mxu0 }
 0x2a3   :  { %v1190_v4 = vadd.f32 %v1113_v3, %v967_v0  ;;  %v1816_v5 = vpop.f32.mrb[9].mxu0  ;;  %v1553_v0 = vld [vmem:[%s2180_s11 + $0x10] sm:$0xff]  ;;  %v1694_v3 = vld [vmem:[%s2179_s10] ss:$0 sm:$0xff] }
 0x2a5   :  { %v1198_v6 = vadd.f32 %v1685_v2, %v1190_v4 }
 0x2a7   :  { %v1202_v7 = vrot.slane %v1198_v6, 1 }
 0x2a8   :  { %v894_v8 = vpop.f32.mrb[6].mxu1 }
 0x2a9   :  { %v1801_v9 = vpop.f32.mrb[7].mxu1  ;;  %v1206_v10 = vmax.f32 %v1198_v6, %v1202_v7 }
 0x2aa   :  { %v1695_v9 = vld [vmem:[%s2181_s12] ss:$0 sm:$0xff] }
 0x2ab   :  { %1823 = vmatpush3.msk.msra.mxu0 %vm1212_vm10, %v1206_v10 }
 0x2ac   :  { %v1038_v12 = vpop.f32.mrb[8].mxu1  ;;  %1825 = vmatmul.mubr.msk.f32.vlgmr.msra.gmra.mrb[10].mxu0 %vm1208_vm11, %v745_v11  ;;  %1865 = vmatprep.subr.bf16.mxu0 %v1916_v19 }
 0x2ad   :  { %v1039_v13 = vadd.f32 %v1038_v12, %v894_v8  ;;  %v1811_v14 = vpop.f32.mrb[9].mxu1  ;;  %1836 = vmatprep.mubr.msk.f32.mxu0 %vm1917_vm4, %v1918_v20  ;;  %1867 = vmatpush3.bf16.msra.mxu0 %v1866_v26 }
 0x2ae   :  { %1871 = vmatprep.subr.bf16.mxu0 %v1916_v19 }
 0x2b0   :  { %v1186_v15 = vpop.f32.mrb[10].mxu1 }
 0x2b1   :  { %v1191_v16 = vadd.f32 %v1186_v15, %v1039_v13  ;;  %v1821_v17 = vpop.f32.mrb[11].mxu1 }
 0x2b3   :  { %v1199_v18 = vadd.f32 %v1685_v2, %v1191_v16 }
 0x2b5   :  { %v1203_v21 = vrot.slane %v1199_v18, 1 }
 0x2b7   :  { %v1207_v22 = vmax.f32 %v1199_v18, %v1203_v21 }
 0x2b9   :  { %1828 = vmatpush3.msk.msra.mxu1 %vm1212_vm10, %v1207_v22 }
 0x2ba   :  { %1830 = vmatmul.mubr.msk.f32.vlgmr.msra.gmra.mrb[12].mxu1 %vm1208_vm11, %v745_v11  ;;  %1868 = vmatprep.subr.bf16.mxu1 %v1916_v19 }
 0x2bb   :  { %1843 = vmatprep.mubr.msk.f32.mxu1 %vm1917_vm4, %v1918_v20  ;;  %1870 = vmatpush3.bf16.msra.mxu1 %v1869_v28 }
 0x37f   :  { %v1282_v29 = vpop.f32.mrb[10].mxu0 }
 0x380   :  { %v1826_v30 = vpop.f32.mrb[11].mxu0  ;;  %v1359_v31 = vmax.f32 %v1282_v29, 0.0 }
 0x382   :  { %v1364_v33 = vsel %vm1363_vm12, %v1359_v31, 0.0 }
 0x38d   :  { %v1355_v32 = vpop.f32.mrb[12].mxu1 }
 0x38e   :  { %v1360_v34 = vmax.f32 %v1355_v32, 0.0  ;;  %v1831_v35 = vpop.f32.mrb[13].mxu1 }
 0x390   :  { %v1365_v36 = vsel %vm1363_vm12, %v1360_v34, 0.0 }
 0x391   :  { %v1366_v37 = vadd.f32 %v1365_v36, %v1364_v33 }
 0x393   :  { %v1368_v38 = vmul.f32 0.5, %v1366_v37 }
 0x395   :  { %v1369_v39 = vsub.f32 %v1359_v31, %v1368_v38  ;;  %v1370_v40 = vsub.f32 %v1360_v34, %v1368_v38 }
 0x397   :  { %v1371_v41 = vmul.f32 %v1369_v39, %v1369_v39  ;;  %v1372_v42 = vmul.f32 %v1370_v40, %v1370_v40 }
 0x399   :  { %v1373_v43 = vsel %vm1363_vm12, %v1371_v41, 0.0  ;;  %v1374_v44 = vsel %vm1363_vm12, %v1372_v42, 0.0 }
 0x39a   :  { %v1375_v45 = vadd.f32 %v1374_v44, %v1373_v43 }
 0x39c   :  { %v1376_v46 = vmul.f32 0.5, %v1375_v45 }
 0x39e   :  { %v1377_v47 = vadd.f32 1e-05, %v1376_v46 }
 0x3a0   :  { %1890 = vrsqrt.f32 %v1377_v47 }
 0x3aa   :  { %v1891_v48 = vpop.eup %1890 }
 0x3ab   :  { %v1379_v50 = vmul.f32 %v1891_v48, %v1369_v39  ;;  %v1380_v51 = vmul.f32 %v1891_v48, %v1370_v40 }
 0x3ad   :  { %v1381_v53 = vmul.f32 %v1379_v50, %v1361_v49  ;;  %v1382_v54 = vmul.f32 %v1380_v51, %v1361_v49 }
 0x3af   :  { %v1383_v55 = vadd.f32 %v1381_v53, %v1362_v52  ;;  %v1384_v56 = vadd.f32 %v1382_v54, %v1362_v52 }
 0x3b1   :  { %v1393_v57 = vrot.slane %v1383_v55, 1  ;;  %v1469_v58 = vrot.slane %v1384_v56, 7 }
 0x3b3   :  { %v1395_v59 = vsel %vm1394_vm13, %v1384_v56, %v1393_v57  ;;  %v1470_v60 = vsel %vm1394_vm13, %v1469_v58, %v1383_v55 }
 0x3b4   :  { %1837 = vmatmul.mubr.msk.f32.vlgmr.msra.gmra.mrb[12].mxu0 %vm1396_vm14, %v1395_v59  ;;  %1844 = vmatmul.mubr.msk.f32.vlgmr.msra.gmra.mrb[14].mxu1 %vm1396_vm14, %v1470_v60 }
 0x3b5   :  { %1854 = vmatprep.mubr.msk.f32.mxu0 %vm1917_vm4, %v1918_v20  ;;  %1873 = vmatpush3.bf16.msra.mxu0 %v1872_v63  ;;  %v1554_v20 = vld [vmem:[%s2180_s11 + $0x18] sm:$0xff]  ;;  %s1920_s11 = smov [#allocation2]  }
 0x3b6   :  { %1874 = vmatprep.subr.bf16.mxu0 %v1916_v19  ;;  %v1875_v1 = vpack.c.bf16 %v1554_v20, %v1553_v0  ;;  %s1644_s28 = sshll.u32 %s1920_s11, 4  ;;  %s1645_s28 = int_to_ptr.vmem [resolvable:$true] %s1644_s28 }
 0x3b7   :  { %s1892_s10 = scalar_lea.vmem %s1645_s28, 32  ;;  %p1897_p1 = scmp.lt.s32.totalorder %s1645_s28, %s1645_s28 }
 0x3b8   :  { %p1893_p0 = scmp.ne.s32.totalorder %s1645_s28, %s1892_s10  ;;  %p1898_p2 = scmp.lt.s32.totalorder %s1892_s10, %s1892_s10 }
 0x3b9   :  { %1876 = vmatpush3.bf16.msra.mxu0 %v1875_v1 }
 0x3ba   :  { %p1899_p3 = por %p1898_p2, %p1897_p1 }
 0x3bc   :  { %p1900_p4 = pnand %p1899_p3, %p1893_p0 }
 0x487   :  { %v1465_v2 = vpop.f32.mrb[12].mxu0  ;;  %v1539_v4 = vpop.f32.mrb[14].mxu1 }
 0x488   :  { %v1540_v5 = vadd.f32 %v1539_v4, %v1465_v2  ;;  %v1838_v6 = vpop.f32.mrb[13].mxu0  ;;  %v1845_v7 = vpop.f32.mrb[15].mxu1 }
 0x48a   :  { %v1549_v19 = vadd.f32 %v1694_v3, %v1540_v5 }
 0x48c   :  { %v1550_v8 = vmax.f32 %v1549_v19, 0.0 }
 0x48e   :  { %1855 = vmatmul.mubr.msk.f32.vlgmr.msra.gmra.mrb[14].mxu0 %vm1562_vm15, %v1550_v8 }
 0x561   :  { %v1632_v10 = vpop.f32.mrb[14].mxu0 }
 0x562   :  { %v1633_v11 = vadd.f32 %v1695_v9, %v1632_v10  ;;  %v1856_v12 = vpop.f32.mrb[15].mxu0 }
 0x564   :  { %1637 = vst.msk [vmem:[#allocation2] sm:$0x3] %vm1636_vm0, %v1633_v11 }
 0x565   :  { %1903 = shalt.err (!%p1900_p4)
}
 0x566   :  { %s1904_s5 = scalar_lea.hbm %s2182_s13, 32 }
 0x567   :  { %p1905_p5 = scmp.ne.s32.totalorder %s2182_s13, %s1904_s5  ;;  %p1908_p6 = scmp.lt.u32.totalorder %s1904_s5, %s2182_s13 }
 0x569   :  { %p1910_p7 = pnand %p1908_p6, %p1905_p5 }
 0x56b   :  { %1913 = shalt.err (!%p1910_p7)
}
 0x56c   :  { %1647 = dma.vmem_to_hbm [thread:$0]  %s1645_s28, 32, %s2182_s13, [#allocation3]  }
 0x56d   :  { %1914 = dma.done.wait [#allocation3], 32  }
 0x56e   :  { %1915 = vsyncadd [#allocation3], 4294967264 }
 0x56f   :  { %1651 = vsyncpa [#allocation3], 1 }

</bundles_post_ra>
